<compile_context>
chip_gen: v5e
topology: v5e:2x2
jax: 0.10.0
libtpu: 0.0.40
codegen_flags: <defaults>
</compile_context>

<pallas_src>
import math

import jax
import jax.numpy as jnp
from jax.experimental import pallas as pl
from jax.experimental.pallas import tpu as pltpu

BETA = 0.1          # GCNII-style mixing coefficient
LN_EPS = 1e-5       # nn.LayerNorm default eps
INV_SQRT2 = 1.0 / math.sqrt(2.0)


def _res_graph_conv_kernel(adjb_ref, w1_ref, b1_ref, g_ref, bln_ref,
                           w2_ref, b2_ref, x_ref, out_ref):
    """Fused: gconv1 -> LayerNorm -> gconv2 -> GELU -> + residual.

    Single grid step; the whole batch lives in VMEM as a (B*J, C) slab.
    adjb_ref is the block-diagonal batched adjacency already scaled by (1-beta).
    """
    x = x_ref[...].astype(jnp.float32)            # (B*J, C)  residual == x0 == x
    adjb = adjb_ref[...].astype(jnp.float32)      # (B*J, B*J), pre-scaled by (1-beta)

    bx = BETA * x                                  # shared x0 term for both layers

    # ---- GraphConvBlockI: GSNetGraphConv(input_dim -> hid_dim) + LayerNorm ----
    h1 = jnp.dot(adjb, x, preferred_element_type=jnp.float32) + bx          # (B*J, C)
    y1 = jnp.dot(h1, w1_ref[...], preferred_element_type=jnp.float32) + b1_ref[...]

    # single-pass LayerNorm statistics: var = E[y^2] - mu^2
    mu = jnp.mean(y1, axis=-1, keepdims=True)
    mu2 = jnp.mean(y1 * y1, axis=-1, keepdims=True)
    var = mu2 - mu * mu
    y_ln = (y1 - mu) * jax.lax.rsqrt(var + LN_EPS) * g_ref[...] + bln_ref[...]

    # ---- GraphConvBlockII: GSNetGraphConv(hid_dim -> output_dim) + GELU ----
    h2 = jnp.dot(adjb, y_ln, preferred_element_type=jnp.float32) + bx       # x0 = residual
    y2 = jnp.dot(h2, w2_ref[...], preferred_element_type=jnp.float32) + b2_ref[...]

    # exact (erf-based) GELU, as in torch.nn.GELU()
    gelu = 0.5 * y2 * (1.0 + jax.lax.erf(y2 * INV_SQRT2))

    # ---- residual add ----
    out_ref[...] = (x + gelu).astype(out_ref.dtype)


def res_graph_conv(x, adj, w1, b1, ln_gamma, ln_beta, w2, b2):
    """x: (B, J, C), adj: (J, J), w1/w2: (C, C), b1/b2/ln_*: (1, C)."""
    B, J, C = x.shape
    BJ = B * J

    # Host-side prep (per-model constants / free metadata reshapes):
    #   * fold (1 - beta) into adj,
    #   * block-diagonal replicate over the batch so the whole batch aggregates
    #     in one (B*J, B*J) @ (B*J, C) MXU dot inside the kernel.
    adj_blk = jnp.kron(jnp.eye(B, dtype=adj.dtype), (1.0 - BETA) * adj)      # (B*J, B*J)
    x2d = x.reshape(BJ, C)   # contiguous leading-dim merge, no data movement

    full = lambda shape: pl.BlockSpec(shape, lambda i: (0, 0))

    out2d = pl.pallas_call(
        _res_graph_conv_kernel,
        out_shape=jax.ShapeDtypeStruct((BJ, C), x.dtype),
        grid_spec=pltpu.PrefetchScalarGridSpec(
            num_scalar_prefetch=0,
            grid=(1,),                      # everything fits easily in VMEM
            in_specs=[
                full((BJ, BJ)),             # block-diag (1-beta)*adj
                full((C, C)),               # W1
                full((1, C)),               # b1
                full((1, C)),               # LayerNorm gamma
                full((1, C)),               # LayerNorm beta
                full((C, C)),               # W2
                full((1, C)),               # b2
                full((BJ, C)),              # x (flattened batch)
            ],
            out_specs=full((BJ, C)),
        ),
        compiler_params=pltpu.CompilerParams(
            dimension_semantics=("arbitrary",)),
    )(adj_blk, w1, b1, ln_gamma, ln_beta, w2, b2, x2d)

    return out2d.reshape(B, J, C)


def _reference(x, adj, w1, b1, ln_gamma, ln_beta, w2, b2):
    """Plain-JAX reference of the same forward pass (for a sanity check)."""
    agg1 = jnp.einsum("ij,bjc->bic", adj, x)
    h1 = (1.0 - BETA) * agg1 + BETA * x
    y1 = h1 @ w1 + b1
    mu = jnp.mean(y1, axis=-1, keepdims=True)
    var = jnp.mean((y1 - mu) ** 2, axis=-1, keepdims=True)
    y_ln = (y1 - mu) / jnp.sqrt(var + LN_EPS) * ln_gamma + ln_beta
    agg2 = jnp.einsum("ij,bjc->bic", adj, y_ln)
    h2 = (1.0 - BETA) * agg2 + BETA * x
    y2 = h2 @ w2 + b2
    gelu = 0.5 * y2 * (1.0 + jax.lax.erf(y2 * INV_SQRT2))
    return x + gelu


if __name__ == "__main__":
    # Small shapes: residual add in ResGraphConv requires input_dim == output_dim,
    # and the x0 initial-residual path requires hid_dim == input_dim as well.
    B, J, C = 2, 16, 32   # batch, graph nodes, feature dim (input=hid=output=32)

    key = jax.random.PRNGKey(0)
    kx, kw1, kb1, kw2, kb2 = jax.random.split(key, 5)

    x = jax.random.normal(kx, (B, J, C), dtype=jnp.float32)

    # Deterministic normalized adjacency: chain graph over J nodes + self loops,
    # symmetrically normalized D^-1/2 (A + I) D^-1/2  (plain-JAX glue).
    a = jnp.eye(J, dtype=jnp.float32)
    a = a + jnp.eye(J, k=1, dtype=jnp.float32) + jnp.eye(J, k=-1, dtype=jnp.float32)
    deg = jnp.sum(a, axis=-1)
    d_inv_sqrt = 1.0 / jnp.sqrt(deg)
    adj = a * d_inv_sqrt[:, None] * d_inv_sqrt[None, :]

    # Deterministic parameter init (synthetic, no checkpoint load).
    scale = 1.0 / math.sqrt(C)
    w1 = jax.random.normal(kw1, (C, C), dtype=jnp.float32) * scale
    b1 = jax.random.normal(kb1, (1, C), dtype=jnp.float32) * 0.01
    w2 = jax.random.normal(kw2, (C, C), dtype=jnp.float32) * scale
    b2 = jax.random.normal(kb2, (1, C), dtype=jnp.float32) * 0.01
    ln_gamma = jnp.ones((1, C), dtype=jnp.float32)   # nn.LayerNorm default init
    ln_beta = jnp.zeros((1, C), dtype=jnp.float32)

    out = res_graph_conv(x, adj, w1, b1, ln_gamma, ln_beta, w2, b2)
    out = jax.block_until_ready(out)

    ref = _reference(x, adj, w1, b1, ln_gamma, ln_beta, w2, b2)
    assert out.shape == (B, J, C)
    assert jnp.allclose(out, ref, atol=1e-4, rtol=1e-4), "kernel/reference mismatch"

    print("KERNEL_OK")
</pallas_src>

<mosaic_0001>
module attributes {stable_mosaic.version = 11 : i64} {
  func.func @_res_graph_conv_kernel(%arg0: i32, %arg1: memref<32x32xf32, #tpu.memory_space<vmem>>, %arg2: memref<32x32xf32, #tpu.memory_space<vmem>>, %arg3: memref<1x32xf32, #tpu.memory_space<vmem>>, %arg4: memref<1x32xf32, #tpu.memory_space<vmem>>, %arg5: memref<1x32xf32, #tpu.memory_space<vmem>>, %arg6: memref<32x32xf32, #tpu.memory_space<vmem>>, %arg7: memref<1x32xf32, #tpu.memory_space<vmem>>, %arg8: memref<32x32xf32, #tpu.memory_space<vmem>>, %arg9: memref<32x32xf32, #tpu.memory_space<vmem>>) attributes {dimension_semantics = [#tpu.dimension_semantics<arbitrary>], iteration_bounds = array<i64: 1>, scalar_prefetch = 0 : i64, scratch_operands = 0 : i64, tpu.core_type = #tpu.core_type<tc>, window_params = [{pipeline_mode = #tpu.pipeline_mode<synchronous>, transform_indices = @transform_0, window_bounds = array<i64: 32, 32>}, {pipeline_mode = #tpu.pipeline_mode<synchronous>, transform_indices = @transform_1, window_bounds = array<i64: 32, 32>}, {pipeline_mode = #tpu.pipeline_mode<synchronous>, transform_indices = @transform_2, window_bounds = array<i64: 1, 32>}, {pipeline_mode = #tpu.pipeline_mode<synchronous>, transform_indices = @transform_3, window_bounds = array<i64: 1, 32>}, {pipeline_mode = #tpu.pipeline_mode<synchronous>, transform_indices = @transform_4, window_bounds = array<i64: 1, 32>}, {pipeline_mode = #tpu.pipeline_mode<synchronous>, transform_indices = @transform_5, window_bounds = array<i64: 32, 32>}, {pipeline_mode = #tpu.pipeline_mode<synchronous>, transform_indices = @transform_6, window_bounds = array<i64: 1, 32>}, {pipeline_mode = #tpu.pipeline_mode<synchronous>, transform_indices = @transform_7, window_bounds = array<i64: 32, 32>}, {pipeline_mode = #tpu.pipeline_mode<synchronous>, transform_indices = @transform_8, window_bounds = array<i64: 32, 32>}]} {
    %c0 = arith.constant 0 : index
    %c0_0 = arith.constant 0 : index
    %0 = vector.load %arg8[%c0, %c0_0] : memref<32x32xf32, #tpu.memory_space<vmem>>, vector<32x32xf32>
    %c0_1 = arith.constant 0 : index
    %c0_2 = arith.constant 0 : index
    %1 = vector.load %arg1[%c0_1, %c0_2] : memref<32x32xf32, #tpu.memory_space<vmem>>, vector<32x32xf32>
    %cst = arith.constant 1.000000e-01 : f32
    %2 = vector.broadcast %cst : f32 to vector<32x32xf32>
    %3 = arith.mulf %2, %0 : vector<32x32xf32>
    %cst_3 = arith.constant dense<0.000000e+00> : vector<32x32xf32>
    %4 = tpu.matmul %1, %0, %cst_3 {dimension_numbers = #tpu.dot_dimension_numbers<[1], [0], [0], [1], [0, 0, 1, 1], [], []>} : vector<32x32xf32>, vector<32x32xf32>, vector<32x32xf32> -> vector<32x32xf32>
    %5 = arith.addf %4, %3 : vector<32x32xf32>
    %c0_4 = arith.constant 0 : index
    %c0_5 = arith.constant 0 : index
    %6 = vector.load %arg2[%c0_4, %c0_5] : memref<32x32xf32, #tpu.memory_space<vmem>>, vector<32x32xf32>
    %cst_6 = arith.constant dense<0.000000e+00> : vector<32x32xf32>
    %7 = tpu.matmul %5, %6, %cst_6 {dimension_numbers = #tpu.dot_dimension_numbers<[1], [0], [0], [1], [0, 0, 1, 1], [], []>} : vector<32x32xf32>, vector<32x32xf32>, vector<32x32xf32> -> vector<32x32xf32>
    %c0_7 = arith.constant 0 : index
    %c0_8 = arith.constant 0 : index
    %8 = vector.load %arg3[%c0_7, %c0_8] : memref<1x32xf32, #tpu.memory_space<vmem>>, vector<1x32xf32>
    %9 = vector.broadcast %8 : vector<1x32xf32> to vector<32x32xf32>
    %10 = arith.addf %7, %9 : vector<32x32xf32>
    %cst_9 = arith.constant dense<0.000000e+00> : vector<32xf32>
    %11 = vector.multi_reduction <add>, %10, %cst_9 [1] : vector<32x32xf32> to vector<32xf32>
    %12 = vector.shape_cast %11 : vector<32xf32> to vector<32x1xf32>
    %cst_10 = arith.constant 3.200000e+01 : f32
    %13 = vector.broadcast %cst_10 : f32 to vector<32x1xf32>
    %14 = arith.divf %12, %13 : vector<32x1xf32>
    %15 = arith.mulf %10, %10 : vector<32x32xf32>
    %cst_11 = arith.constant dense<0.000000e+00> : vector<32xf32>
    %16 = vector.multi_reduction <add>, %15, %cst_11 [1] : vector<32x32xf32> to vector<32xf32>
    %17 = vector.shape_cast %16 : vector<32xf32> to vector<32x1xf32>
    %cst_12 = arith.constant 3.200000e+01 : f32
    %18 = vector.broadcast %cst_12 : f32 to vector<32x1xf32>
    %19 = arith.divf %17, %18 : vector<32x1xf32>
    %20 = arith.mulf %14, %14 : vector<32x1xf32>
    %21 = arith.subf %19, %20 : vector<32x1xf32>
    %22 = vector.broadcast %14 : vector<32x1xf32> to vector<32x32xf32>
    %23 = arith.subf %10, %22 : vector<32x32xf32>
    %cst_13 = arith.constant 9.99999974E-6 : f32
    %24 = vector.broadcast %cst_13 : f32 to vector<32x1xf32>
    %25 = arith.addf %21, %24 : vector<32x1xf32>
    %26 = math.rsqrt %25 : vector<32x1xf32>
    %27 = vector.broadcast %26 : vector<32x1xf32> to vector<32x32xf32>
    %28 = arith.mulf %23, %27 : vector<32x32xf32>
    %c0_14 = arith.constant 0 : index
    %c0_15 = arith.constant 0 : index
    %29 = vector.load %arg4[%c0_14, %c0_15] : memref<1x32xf32, #tpu.memory_space<vmem>>, vector<1x32xf32>
    %30 = vector.broadcast %29 : vector<1x32xf32> to vector<32x32xf32>
    %31 = arith.mulf %28, %30 : vector<32x32xf32>
    %c0_16 = arith.constant 0 : index
    %c0_17 = arith.constant 0 : index
    %32 = vector.load %arg5[%c0_16, %c0_17] : memref<1x32xf32, #tpu.memory_space<vmem>>, vector<1x32xf32>
    %33 = vector.broadcast %32 : vector<1x32xf32> to vector<32x32xf32>
    %34 = arith.addf %31, %33 : vector<32x32xf32>
    %cst_18 = arith.constant dense<0.000000e+00> : vector<32x32xf32>
    %35 = tpu.matmul %1, %34, %cst_18 {dimension_numbers = #tpu.dot_dimension_numbers<[1], [0], [0], [1], [0, 0, 1, 1], [], []>} : vector<32x32xf32>, vector<32x32xf32>, vector<32x32xf32> -> vector<32x32xf32>
    %36 = arith.addf %35, %3 : vector<32x32xf32>
    %c0_19 = arith.constant 0 : index
    %c0_20 = arith.constant 0 : index
    %37 = vector.load %arg6[%c0_19, %c0_20] : memref<32x32xf32, #tpu.memory_space<vmem>>, vector<32x32xf32>
    %cst_21 = arith.constant dense<0.000000e+00> : vector<32x32xf32>
    %38 = tpu.matmul %36, %37, %cst_21 {dimension_numbers = #tpu.dot_dimension_numbers<[1], [0], [0], [1], [0, 0, 1, 1], [], []>} : vector<32x32xf32>, vector<32x32xf32>, vector<32x32xf32> -> vector<32x32xf32>
    %c0_22 = arith.constant 0 : index
    %c0_23 = arith.constant 0 : index
    %39 = vector.load %arg7[%c0_22, %c0_23] : memref<1x32xf32, #tpu.memory_space<vmem>>, vector<1x32xf32>
    %40 = vector.broadcast %39 : vector<1x32xf32> to vector<32x32xf32>
    %41 = arith.addf %38, %40 : vector<32x32xf32>
    %cst_24 = arith.constant 5.000000e-01 : f32
    %42 = vector.broadcast %cst_24 : f32 to vector<32x32xf32>
    %43 = arith.mulf %42, %41 : vector<32x32xf32>
    %cst_25 = arith.constant 0.707106769 : f32
    %44 = vector.broadcast %cst_25 : f32 to vector<32x32xf32>
    %45 = arith.mulf %41, %44 : vector<32x32xf32>
    %46 = math.erf %45 : vector<32x32xf32>
    %cst_26 = arith.constant 1.000000e+00 : f32
    %47 = vector.broadcast %cst_26 : f32 to vector<32x32xf32>
    %48 = arith.addf %47, %46 : vector<32x32xf32>
    %49 = arith.mulf %43, %48 : vector<32x32xf32>
    %50 = arith.addf %0, %49 : vector<32x32xf32>
    %c0_27 = arith.constant 0 : index
    %c0_28 = arith.constant 0 : index
    %51 = vector.load %arg9[%c0_27, %c0_28] : memref<32x32xf32, #tpu.memory_space<vmem>>, vector<32x32xf32>
    tpu.vector_store %arg9[%c0_27, %c0_28], %50 {strides = array<i32>} : memref<32x32xf32, #tpu.memory_space<vmem>>, vector<32x32xf32>,
    return
  }
  func.func @transform_0(%arg0: i32) -> (i32, i32) {
    %c0_i32 = arith.constant 0 : i32
    %c0_i32_0 = arith.constant 0 : i32
    %c0_i32_1 = arith.constant 0 : i32
    return %c0_i32, %c0_i32_0 : i32, i32
  }
  func.func @transform_1(%arg0: i32) -> (i32, i32) {
    %c0_i32 = arith.constant 0 : i32
    %c0_i32_0 = arith.constant 0 : i32
    %c0_i32_1 = arith.constant 0 : i32
    return %c0_i32, %c0_i32_0 : i32, i32
  }
  func.func @transform_2(%arg0: i32) -> (i32, i32) {
    %c0_i32 = arith.constant 0 : i32
    %c0_i32_0 = arith.constant 0 : i32
    %c0_i32_1 = arith.constant 0 : i32
    return %c0_i32, %c0_i32_0 : i32, i32
  }
  func.func @transform_3(%arg0: i32) -> (i32, i32) {
    %c0_i32 = arith.constant 0 : i32
    %c0_i32_0 = arith.constant 0 : i32
    %c0_i32_1 = arith.constant 0 : i32
    return %c0_i32, %c0_i32_0 : i32, i32
  }
  func.func @transform_4(%arg0: i32) -> (i32, i32) {
    %c0_i32 = arith.constant 0 : i32
    %c0_i32_0 = arith.constant 0 : i32
    %c0_i32_1 = arith.constant 0 : i32
    return %c0_i32, %c0_i32_0 : i32, i32
  }
  func.func @transform_5(%arg0: i32) -> (i32, i32) {
    %c0_i32 = arith.constant 0 : i32
    %c0_i32_0 = arith.constant 0 : i32
    %c0_i32_1 = arith.constant 0 : i32
    return %c0_i32, %c0_i32_0 : i32, i32
  }
  func.func @transform_6(%arg0: i32) -> (i32, i32) {
    %c0_i32 = arith.constant 0 : i32
    %c0_i32_0 = arith.constant 0 : i32
    %c0_i32_1 = arith.constant 0 : i32
    return %c0_i32, %c0_i32_0 : i32, i32
  }
  func.func @transform_7(%arg0: i32) -> (i32, i32) {
    %c0_i32 = arith.constant 0 : i32
    %c0_i32_0 = arith.constant 0 : i32
    %c0_i32_1 = arith.constant 0 : i32
    return %c0_i32, %c0_i32_0 : i32, i32
  }
  func.func @transform_8(%arg0: i32) -> (i32, i32) {
    %c0_i32 = arith.constant 0 : i32
    %c0_i32_0 = arith.constant 0 : i32
    %c0_i32_1 = arith.constant 0 : i32
    return %c0_i32, %c0_i32_0 : i32, i32
  }
}

</mosaic_0001>

<bundles_post_ra>
// kernel: tpu_custom_call.1
= control target key start
LH: loop header
LB: loop body
LE: loop exit
PB: predicated region body
PF: predicated region fallthrough
CT: control target
= control target key end

     0   :  { %13 = vsyncpa [#allocation3], 0  ;;  %s1057_s0 = inlined_call_operand.hbm [shape: f32[32,32], index: 0, kind: input, shape index: {}]   ;;  %s1058_s1 = inlined_call_operand.hbm [shape: f32[32,32], index: 1, kind: input, shape index: {}]   ;;  %s1059_s2 = inlined_call_operand.vmem [shape: f32[1,32], index: 2, kind: input, shape index: {}]   ;;  %s1060_s3 = inlined_call_operand.vmem [shape: f32[1,32], index: 3, kind: input, shape index: {}]   ;;  %s1061_s4 = inlined_call_operand.vmem [shape: f32[1,32], index: 4, kind: input, shape index: {}]   ;;  %s1062_s5 = inlined_call_operand.hbm [shape: f32[32,32], index: 5, kind: input, shape index: {}]   ;;  %s1063_s6 = inlined_call_operand.vmem [shape: f32[1,32], index: 6, kind: input, shape index: {}]   ;;  %s1064_s7 = inlined_call_operand.hbm [shape: f32[32,32], index: 7, kind: input, shape index: {}]   ;;  %s1065_s8 = inlined_call_operand.hbm [shape: f32[32,32], index: 8, kind: output, shape index: {}]  }
   0x1   :  { %14 = vsyncpa [#allocation6], 0 }
   0x2   :  { %15 = vsyncpa [#allocation9], 0 }
   0x3   :  { %16 = vsyncpa [#allocation4], 0  ;;  %s34_s29 = sshll.u32 %s1058_s1, 4  ;;  %s776_s30 = smov [#allocation5]   ;;  %s35_s29 = int_to_ptr.hbm [resolvable:$true] %s34_s29 }
   0x4   :  { %s36_s9 = sshll.u32 %s776_s30, 4  ;;  %s21_s12 = sshll.u32 %s1057_s0, 4  ;;  %s37_s9 = int_to_ptr.vmem [resolvable:$true] %s36_s9  ;;  %s22_s12 = int_to_ptr.hbm [resolvable:$true] %s21_s12 }
   0x5   :  { %s777_s13 = smov 128   ;;  %s778_s14 = smov 8  }
   0x6   :  { %42 = dma.hbm_to_vmem [thread:$0]  %s35_s29, 512, %s37_s9, [#allocation6], %s777_s13, %s777_s13, %s778_s14  }
   0x7   :  { %s779_s15 = smov [#allocation2]   ;;  %s53_s1 = sshll.u32 %s1062_s5, 4  ;;  %s54_s1 = int_to_ptr.hbm [resolvable:$true] %s53_s1 }
   0x8   :  { %s23_s16 = sshll.u32 %s779_s15, 4  ;;  %s68_s20 = sshll.u32 %s1064_s7, 4  ;;  %s24_s16 = int_to_ptr.vmem [resolvable:$true] %s23_s16  ;;  %s69_s20 = int_to_ptr.hbm [resolvable:$true] %s68_s20 }
   0x9   :  { %29 = dma.hbm_to_vmem [thread:$0]  %s22_s12, 512, %s24_s16, [#allocation3], %s777_s13, %s777_s13, %s778_s14  }
   0xa   :  { %s780_s21 = smov [#allocation7]   ;;  %s781_s23 = smov [#allocation8]  }
   0xb   :  { %s55_s22 = sshll.u32 %s780_s21, 4  ;;  %s70_s5 = sshll.u32 %s781_s23, 4  ;;  %s56_s22 = int_to_ptr.vmem [resolvable:$true] %s55_s22  ;;  %s71_s5 = int_to_ptr.vmem [resolvable:$true] %s70_s5 }
   0xc   :  { %61 = dma.hbm_to_vmem [thread:$0]  %s54_s1, 512, %s56_s22, [#allocation6], %s777_s13, %s777_s13, %s778_s14  }
   0xd   :  { %76 = dma.hbm_to_vmem [thread:$0]  %s69_s20, 512, %s71_s5, [#allocation9], %s777_s13, %s777_s13, %s778_s14  }
   0xe   :  { %768 = dma.done.wait [#allocation3], 512  }
   0xf   :  { %769 = vsyncadd [#allocation3], 4294966784 }
  0x10   :  { %770 = dma.done.wait [#allocation6], 1024  }
  0x11   :  { %771 = vsyncadd [#allocation6], 4294966272 }
  0x12   :  { %772 = dma.done.wait [#allocation9], 512  }
  0x13   :  { %773 = vsyncadd [#allocation9], 4294966784  ;;  %v853_v0 = vld [vmem:[#allocation8 + $0x18] sm:$0xff]  ;;  %v855_v1 = vld [vmem:[#allocation8 + $0x10] sm:$0xff]  ;;  %vm105_vm0 = vcmask 261120   ;;  %v782_v45 = vmov 32.0  }
  0x14   :  { %130 = vmatpush.msra.mxu0 %v853_v0  ;;  %v858_v2 = vld [vmem:[#allocation8 + $0x8] sm:$0xff]  ;;  %v150_v3 = vld [vmem:[#allocation5 + $0x18] sm:$0xff]  ;;  %v149_v4 = vld [vmem:[#allocation5 + $0x10] sm:$0xff]  ;;  %v892_v18 = vmul.f32 0.1, %v855_v1  ;;  %630 = vrcp.f32 %v782_v45  ;;  %s583_s9 = sshll.u32 %s1065_s8, 4  ;;  %s584_s9 = int_to_ptr.hbm [resolvable:$true] %s583_s9 }
  0x15   :  { %179 = vmatpush.msra.mxu1 %v150_v3  ;;  %v861_v5 = vld [vmem:[#allocation8] sm:$0xff]  ;;  %v869_v7 = vld [vmem:[#allocation2 + $0x8] sm:$0xff]  ;;  %v873_v8 = vld [vmem:[#allocation2 + $0x10] sm:$0xff]  ;;  %v887_v15 = vmul.f32 0.1, %v858_v2 }
  0x16   :  { %131 = vmatpush.msra.mxu0 %v855_v1  ;;  %v864_v6 = vld [vmem:[#allocation2] sm:$0xff]  ;;  %v877_v9 = vld [vmem:[#allocation2 + $0x18] sm:$0xff]  ;;  %v148_v10 = vld [vmem:[#allocation5 + $0x8] sm:$0xff]  ;;  %v882_v12 = vmul.f32 0.1, %v861_v5 }
  0x17   :  { %180 = vmatpush.msra.mxu1 %v149_v4  ;;  %v147_v11 = vld [vmem:[#allocation5] sm:$0xff]  ;;  %v897_v21 = vmul.f32 0.1, %v853_v0 }
  0x18   :  { %132 = vmatpush.msra.mxu0 %v858_v2  ;;  %v626_v25 = vld [vmem:[%s1059_s2] ss:$0 sm:$0xff] }
  0x19   :  { %181 = vmatpush.msra.mxu1 %v148_v10 }
  0x1a   :  { %133 = vmatpush.msra.mxu0 %v861_v5  ;;  %v631_v46 = vpop.eup %630 }
  0x1b   :  { %598 = vmatmul.msk.f32.vlgmr.msra.gmra.mxu0 %vm105_vm0, %v864_v6  ;;  %182 = vmatpush.msra.mxu1 %v147_v11  ;;  %v209_v47 = vmul.f32 32.0, %v631_v46  ;;  %vm213_vm1 = vweird.f32 %v631_v46 }
  0x1d   :  { %v210_v48 = vsub.f32 1.0, %v209_v47 }
  0x1f   :  { %v211_v49 = vmul.f32 %v631_v46, %v210_v48 }
  0x21   :  { %v212_v50 = vadd.f32 %v631_v46, %v211_v49 }
  0x23   :  { %599 = vmatmul.msk.f32.gmra.mxu0 %vm105_vm0, %v869_v7  ;;  %v214_v51 = vsel %vm213_vm1, %v631_v46, %v212_v50 }
  0x2b   :  { %600 = vmatmul.msk.f32.gmra.mxu0 %vm105_vm0, %v873_v8 }
  0x33   :  { %601 = vmatmul.msk.f32.gmra.mxu0 %vm105_vm0, %v877_v9 }
  0x98   :  { %v135_v13 = vpop.f32.mrf.mxu0 }
  0x99   :  { %v136_v14 = vadd.f32 %v135_v13, %v882_v12 }
  0x9b   :  { %602 = vmatmul.msk.f32.vlgmr.msra.gmra.mxu1 %vm105_vm0, %v136_v14 }
  0xa0   :  { %v138_v16 = vpop.f32.mrf.mxu0 }
  0xa1   :  { %v139_v17 = vadd.f32 %v138_v16, %v887_v15 }
  0xa3   :  { %603 = vmatmul.msk.f32.gmra.mxu1 %vm105_vm0, %v139_v17 }
  0xa8   :  { %v141_v19 = vpop.f32.mrf.mxu0 }
  0xa9   :  { %v142_v20 = vadd.f32 %v141_v19, %v892_v18 }
  0xab   :  { %604 = vmatmul.msk.f32.gmra.mxu1 %vm105_vm0, %v142_v20 }
  0xb0   :  { %v144_v22 = vpop.f32.mrf.mxu0 }
  0xb1   :  { %v145_v23 = vadd.f32 %v144_v22, %v897_v21 }
  0xb3   :  { %605 = vmatmul.msk.f32.gmra.mxu1 %vm105_vm0, %v145_v23 }
 0x118   :  { %v184_v24 = vpop.f32.mrf.mxu1 }
 0x119   :  { %v915_v35 = vadd.f32 %v626_v25, %v184_v24 }
 0x11b   :  { %v196_v40 = vsel %vm105_vm0, %v915_v35, 0.0  ;;  %v219_v42 = vmul.f32 %v915_v35, %v915_v35 }
 0x11d   :  { %v223_v44 = vsel %vm105_vm0, %v219_v42, 0.0 }
 0x120   :  { %v187_v26 = vpop.f32.mrf.mxu1 }
 0x121   :  { %v904_v27 = vadd.f32 %v626_v25, %v187_v26 }
 0x123   :  { %v199_v28 = vsel %vm105_vm0, %v904_v27, 0.0  ;;  %v220_v41 = vmul.f32 %v904_v27, %v904_v27 }
 0x124   :  { %200 = vadd.xlane.f32.xlu1 %v199_v28 }
 0x125   :  { %v226_v43 = vsel %vm105_vm0, %v220_v41, 0.0 }
 0x128   :  { %v190_v29 = vpop.f32.mrf.mxu1 }
 0x129   :  { %v908_v30 = vadd.f32 %v626_v25, %v190_v29 }
 0x12b   :  { %v202_v31 = vsel %vm105_vm0, %v908_v30, 0.0  ;;  %v221_v32 = vmul.f32 %v908_v30, %v908_v30 }
 0x12c   :  { %203 = vadd.xlane.f32.xlu0 %v202_v31 }
 0x12d   :  { %v229_v33 = vsel %vm105_vm0, %v221_v32, 0.0 }
 0x12e   :  { %230 = vadd.xlane.f32.xlu2 %v229_v33 }
 0x130   :  { %v193_v34 = vpop.f32.mrf.mxu1 }
 0x131   :  { %v917_v36 = vadd.f32 %v626_v25, %v193_v34 }
 0x133   :  { %v205_v37 = vsel %vm105_vm0, %v917_v36, 0.0  ;;  %v222_v38 = vmul.f32 %v917_v36, %v917_v36 }
 0x134   :  { %206 = vadd.xlane.f32.xlu0 %v205_v37 }
 0x135   :  { %v232_v39 = vsel %vm105_vm0, %v222_v38, 0.0 }
 0x136   :  { %233 = vadd.xlane.f32.xlu1 %v232_v39  ;;  %197 = vadd.xlane.f32.xlu2 %v196_v40 }
 0x13c   :  { %227 = vadd.xlane.f32.xlu0 %v226_v43 }
 0x13e   :  { %224 = vadd.xlane.f32.xlu1 %v223_v44 }
 0x197   :  { %v201_v54 = vpop.xlane.xlu1 %200 }
 0x198   :  { %v932_v10 = vmul.f32 %v214_v51, %v201_v54 }
 0x19a   :  { %v240_v20 = vmul.f32 %v932_v10, %v932_v10 }
 0x19f   :  { %v204_v52 = vpop.xlane.xlu0 %203 }
 0x1a0   :  { %v217_v53 = vmul.f32 %v214_v51, %v204_v52  ;;  %v627_v52 = vld [vmem:[%s1060_s3] ss:$0 sm:$0xff] }
 0x1a1   :  { %v231_v55 = vpop.xlane.xlu2 %230 }
 0x1a2   :  { %v241_v56 = vmul.f32 %v217_v53, %v217_v53  ;;  %v237_v57 = vmul.f32 %v231_v55, %v214_v51  ;;  %v249_v47 = vsub.f32 %v908_v30, %v217_v53  ;;  %v628_v53 = vld [vmem:[%s1061_s4] ss:$0 sm:$0xff] }
 0x1a4   :  { %v245_v58 = vsub.f32 %v237_v57, %v241_v56 }
 0x1a6   :  { %v253_v59 = vadd.f32 1e-05, %v245_v58 }
 0x1a7   :  { %v207_v60 = vpop.xlane.xlu0 %206 }
 0x1a8   :  { %632 = vrsqrt.f32 %v253_v59  ;;  %v218_v61 = vmul.f32 %v214_v51, %v207_v60  ;;  %vm281_vm3 = vweird.f32 %v253_v59 }
 0x1a9   :  { %v234_v62 = vpop.xlane.xlu1 %233  ;;  %v198_v4 = vpop.xlane.xlu2 %197 }
 0x1aa   :  { %v242_v63 = vmul.f32 %v218_v61, %v218_v61  ;;  %v238_v3 = vmul.f32 %v234_v62, %v214_v51  ;;  %v934_v16 = vmul.f32 %v214_v51, %v198_v4 }
 0x1ac   :  { %v246_v11 = vsub.f32 %v238_v3, %v242_v63  ;;  %v239_v25 = vmul.f32 %v934_v16, %v934_v16  ;;  %v248_v63 = vsub.f32 %v904_v27, %v932_v10 }
 0x1ae   :  { %v633_v13 = vpop.eup %632  ;;  %v254_v14 = vadd.f32 1e-05, %v246_v11 }
 0x1af   :  { %v276_v17 = vmul.f32 %v633_v13, %v253_v59  ;;  %v228_v19 = vpop.xlane.xlu0 %227  ;;  %vm282_vm2 = vweird.f32 %v633_v13 }
 0x1b0   :  { %634 = vrsqrt.f32 %v254_v14  ;;  %v236_v22 = vmul.f32 %v228_v19, %v214_v51  ;;  %vm283_vm4 = vmor %vm281_vm3, %vm282_vm2  ;;  %vm291_vm6 = vweird.f32 %v254_v14 }
 0x1b1   :  { %v277_v23 = vmul.f32 %v633_v13, %v276_v17  ;;  %v225_v24 = vpop.xlane.xlu1 %224 }
 0x1b2   :  { %v244_v26 = vsub.f32 %v236_v22, %v240_v20  ;;  %v235_v28 = vmul.f32 %v225_v24, %v214_v51  ;;  %v250_v51 = vsub.f32 %v917_v36, %v218_v61  ;;  %v347_v20 = vld [vmem:[#allocation7 + $0x18] sm:$0xff]  ;;  %v346_v22 = vld [vmem:[#allocation7 + $0x10] sm:$0xff] }
 0x1b3   :  { %v278_v29 = vmul.f32 0.5, %v277_v23  ;;  %376 = vmatpush.msra.mxu3 %v347_v20 }
 0x1b4   :  { %v252_v31 = vadd.f32 1e-05, %v244_v26  ;;  %v243_v32 = vsub.f32 %v235_v28, %v239_v25 }
 0x1b5   :  { %v279_v33 = vsub.f32 1.5, %v278_v29  ;;  %377 = vmatpush.msra.mxu3 %v346_v22 }
 0x1b6   :  { %v635_v34 = vpop.eup %634  ;;  %636 = vrsqrt.f32 %v252_v31  ;;  %v251_v37 = vadd.f32 1e-05, %v243_v32  ;;  %vm271_vm9 = vweird.f32 %v252_v31 }
 0x1b7   :  { %v286_v38 = vmul.f32 %v635_v34, %v254_v14  ;;  %v280_v40 = vmul.f32 %v633_v13, %v279_v33  ;;  %vm292_vm5 = vweird.f32 %v635_v34 }
 0x1b8   :  { %638 = vrsqrt.f32 %v251_v37  ;;  %vm293_vm7 = vmor %vm291_vm6, %vm292_vm5  ;;  %vm261_vm12 = vweird.f32 %v251_v37 }
 0x1b9   :  { %v287_v39 = vmul.f32 %v635_v34, %v286_v38  ;;  %v284_v45 = vsel %vm283_vm4, %v633_v13, %v280_v40  ;;  %v247_v13 = vsub.f32 %v915_v35, %v934_v16  ;;  %v345_v35 = vld [vmem:[#allocation7 + $0x8] sm:$0xff]  ;;  %v344_v16 = vld [vmem:[#allocation7] sm:$0xff] }
 0x1ba   :  { %v297_v54 = vmul.f32 %v284_v45, %v249_v47  ;;  %378 = vmatpush.msra.mxu3 %v345_v35 }
 0x1bb   :  { %v288_v41 = vmul.f32 0.5, %v287_v39 }
 0x1bc   :  { %v637_v42 = vpop.eup %636  ;;  %v305_v62 = vmul.f32 %v627_v52, %v297_v54  ;;  %379 = vmatpush.msra.mxu3 %v344_v16 }
 0x1bd   :  { %v289_v43 = vsub.f32 1.5, %v288_v41  ;;  %v266_v44 = vmul.f32 %v637_v42, %v252_v31  ;;  %vm272_vm8 = vweird.f32 %v637_v42 }
 0x1be   :  { %v639_v46 = vpop.eup %638  ;;  %vm273_vm11 = vmor %vm271_vm9, %vm272_vm8  ;;  %v313_v14 = vadd.f32 %v628_v53, %v305_v62 }
 0x1bf   :  { %v267_v48 = vmul.f32 %v637_v42, %v266_v44  ;;  %v256_v49 = vmul.f32 %v639_v46, %v251_v37  ;;  %v290_v50 = vmul.f32 %v635_v34, %v289_v43  ;;  %vm262_vm10 = vweird.f32 %v639_v46 }
 0x1c0   :  { %vm263_vm13 = vmor %vm261_vm12, %vm262_vm10 }
 0x1c1   :  { %v268_v55 = vmul.f32 0.5, %v267_v48  ;;  %v257_v56 = vmul.f32 %v639_v46, %v256_v49  ;;  %v294_v57 = vsel %vm293_vm7, %v635_v34, %v290_v50 }
 0x1c2   :  { %v298_v58 = vmul.f32 %v294_v57, %v250_v51 }
 0x1c3   :  { %v269_v59 = vsub.f32 1.5, %v268_v55  ;;  %v258_v60 = vmul.f32 0.5, %v257_v56 }
 0x1c4   :  { %v306_v30 = vmul.f32 %v627_v52, %v298_v58 }
 0x1c5   :  { %v259_v36 = vsub.f32 1.5, %v258_v60  ;;  %v270_v61 = vmul.f32 %v637_v42, %v269_v59 }
 0x1c6   :  { %v314_v3 = vadd.f32 %v628_v53, %v306_v30 }
 0x1c7   :  { %v274_v4 = vsel %vm273_vm11, %v637_v42, %v270_v61  ;;  %v260_v11 = vmul.f32 %v639_v46, %v259_v36 }
 0x1c8   :  { %327 = vmatpush.msra.mxu2 %v314_v3  ;;  %v296_v17 = vmul.f32 %v274_v4, %v248_v63 }
 0x1c9   :  { %v264_v19 = vsel %vm263_vm13, %v639_v46, %v260_v11 }
 0x1ca   :  { %328 = vmatpush.msra.mxu2 %v313_v14  ;;  %v304_v23 = vmul.f32 %v627_v52, %v296_v17  ;;  %v295_v24 = vmul.f32 %v264_v19, %v247_v13 }
 0x1cc   :  { %v312_v27 = vadd.f32 %v628_v53, %v304_v23  ;;  %v303_v10 = vmul.f32 %v627_v52, %v295_v24 }
 0x1ce   :  { %329 = vmatpush.msra.mxu2 %v312_v27  ;;  %v311_v25 = vadd.f32 %v628_v53, %v303_v10 }
 0x1d0   :  { %330 = vmatpush.msra.mxu2 %v311_v25 }
 0x1d1   :  { %606 = vmatmul.msk.f32.vlgmr.msra.gmra.mxu2 %vm105_vm0, %v864_v6 }
 0x1d9   :  { %607 = vmatmul.msk.f32.gmra.mxu2 %vm105_vm0, %v869_v7 }
 0x1e1   :  { %608 = vmatmul.msk.f32.gmra.mxu2 %vm105_vm0, %v873_v8 }
 0x1e9   :  { %609 = vmatmul.msk.f32.gmra.mxu2 %vm105_vm0, %v877_v9 }
 0x254   :  { %v332_v26 = vpop.f32.mrf.mxu2 }
 0x255   :  { %v333_v28 = vadd.f32 %v332_v26, %v882_v12  ;;  %v629_v12 = vld [vmem:[%s1063_s6] ss:$0 sm:$0xff]  ;;  %s783_s6 = smov [#allocation10]  }
 0x256   :  { %s581_s28 = sshll.u32 %s783_s6, 4  ;;  %s582_s28 = int_to_ptr.vmem [resolvable:$true] %s581_s28 }
 0x257   :  { %610 = vmatmul.msk.f32.vlgmr.msra.gmra.mxu3 %vm105_vm0, %v333_v28 }
 0x25c   :  { %v335_v29 = vpop.f32.mrf.mxu2 }
 0x25d   :  { %v336_v6 = vadd.f32 %v335_v29, %v887_v15 }
 0x25f   :  { %611 = vmatmul.msk.f32.gmra.mxu3 %vm105_vm0, %v336_v6 }
 0x264   :  { %v338_v7 = vpop.f32.mrf.mxu2 }
 0x265   :  { %v339_v8 = vadd.f32 %v338_v7, %v892_v18 }
 0x267   :  { %612 = vmatmul.msk.f32.gmra.mxu3 %vm105_vm0, %v339_v8 }
 0x26c   :  { %v341_v9 = vpop.f32.mrf.mxu2 }
 0x26d   :  { %v342_v31 = vadd.f32 %v341_v9, %v897_v21 }
 0x26f   :  { %613 = vmatmul.msk.f32.gmra.mxu3 %vm105_vm0, %v342_v31 }
 0x2da   :  { %v381_v32 = vpop.f32.mrf.mxu3 }
 0x2db   :  { %v971_v33 = vadd.f32 %v629_v12, %v381_v32 }
 0x2dd   :  { %v974_v15 = vmul.f32 0.70710677, %v971_v33 }
 0x2df   :  { %v401_v18 = vmul.f32 %v974_v15, %v974_v15 }
 0x2e1   :  { %v402_v34 = vmin.f32 %v401_v18, 16.0 }
 0x2e2   :  { %v384_v37 = vpop.f32.mrf.mxu3 }
 0x2e3   :  { %v403_v38 = vmul.f32 2.1237322e-06, %v402_v34  ;;  %v414_v39 = vmul.f32 3.8918573e-05, %v402_v34  ;;  %v978_v21 = vadd.f32 %v629_v12, %v384_v37 }
 0x2e5   :  { %v404_v40 = vadd.f32 0.00028619796, %v403_v38  ;;  %v415_v41 = vadd.f32 0.001143296, %v414_v39  ;;  %v981_v42 = vmul.f32 0.70710677, %v978_v21 }
 0x2e7   :  { %v405_v43 = vmul.f32 %v404_v40, %v402_v34  ;;  %v416_v44 = vmul.f32 %v415_v41, %v402_v34  ;;  %v441_v45 = vmul.f32 %v981_v42, %v981_v42 }
 0x2e9   :  { %v406_v46 = vadd.f32 0.0036580483, %v405_v43  ;;  %v417_v47 = vadd.f32 0.014752088, %v416_v44  ;;  %v985_v48 = vmin.f32 %v441_v45, 16.0 }
 0x2ea   :  { %v387_v49 = vpop.f32.mrf.mxu3 }
 0x2eb   :  { %v418_v50 = vmul.f32 %v417_v47, %v402_v34  ;;  %v987_v51 = vadd.f32 %v629_v12, %v387_v49  ;;  %v407_v52 = vmul.f32 %v406_v46, %v402_v34  ;;  %v443_v54 = vmul.f32 2.1237322e-06, %v985_v48 }
 0x2ec   :  { %v454_v55 = vmul.f32 3.8918573e-05, %v985_v48 }
 0x2ed   :  { %v419_v56 = vadd.f32 0.112945676, %v418_v50  ;;  %v444_v57 = vadd.f32 0.00028619796, %v443_v54  ;;  %v992_v59 = vmul.f32 0.70710677, %v987_v51 }
 0x2ee   :  { %v455_v58 = vadd.f32 0.001143296, %v454_v55  ;;  %v408_v30 = vadd.f32 0.05243302, %v407_v52 }
 0x2ef   :  { %v420_v60 = vmul.f32 %v419_v56, %v402_v34  ;;  %v445_v53 = vmul.f32 %v444_v57, %v985_v48  ;;  %v481_v36 = vmul.f32 %v992_v59, %v992_v59 }
 0x2f0   :  { %v456_v62 = vmul.f32 %v455_v58, %v985_v48  ;;  %v409_v17 = vmul.f32 %v408_v30, %v402_v34 }
 0x2f1   :  { %v421_v61 = vadd.f32 0.4994258, %v420_v60  ;;  %v998_v3 = vmin.f32 %v481_v36, 16.0  ;;  %v446_v13 = vadd.f32 0.0036580483, %v445_v53 }
 0x2f2   :  { %v457_v63 = vadd.f32 0.014752088, %v456_v62  ;;  %v390_v4 = vpop.f32.mrf.mxu3  ;;  %v410_v35 = vadd.f32 0.18741608, %v409_v17 }
 0x2f3   :  { %v422_v11 = vmul.f32 %v421_v61, %v402_v34  ;;  %v1000_v14 = vadd.f32 %v629_v12, %v390_v4  ;;  %v483_v20 = vmul.f32 2.1237322e-06, %v998_v3  ;;  %v494_v23 = vmul.f32 3.8918573e-05, %v998_v3 }
 0x2f4   :  { %v458_v19 = vmul.f32 %v457_v63, %v985_v48  ;;  %v447_v25 = vmul.f32 %v446_v13, %v985_v48  ;;  %v411_v31 = vmul.f32 %v410_v35, %v402_v34 }
 0x2f5   :  { %v423_v22 = vadd.f32 1.0, %v422_v11  ;;  %v1006_v24 = vmul.f32 0.70710677, %v1000_v14  ;;  %v484_v10 = vadd.f32 0.00028619796, %v483_v20 }
 0x2f6   :  { %v459_v27 = vadd.f32 0.112945676, %v458_v19  ;;  %v495_v28 = vadd.f32 0.001143296, %v494_v23  ;;  %v448_v7 = vadd.f32 0.05243302, %v447_v25 }
 0x2f7   :  { %640 = vrcp.f32 %v423_v22  ;;  %v485_v26 = vmul.f32 %v484_v10, %v998_v3  ;;  %v521_v29 = vmul.f32 %v1006_v24, %v1006_v24  ;;  %v412_v47 = vadd.f32 1.1283791, %v411_v31 }
 0x2f8   :  { %v460_v16 = vmul.f32 %v459_v27, %v985_v48  ;;  %v496_v8 = vmul.f32 %v495_v28, %v998_v3  ;;  %v449_v43 = vmul.f32 %v448_v7, %v985_v48  ;;  %v433_v34 = vand.u32 2147483647, %v423_v22 }
 0x2f9   :  { %v1014_v9 = vmin.f32 %v521_v29, 16.0  ;;  %v486_v32 = vadd.f32 0.0036580483, %v485_v26  ;;  %v435_v50 = vand.u32 2147483648, %v423_v22  ;;  %vm429_vm15 = vweird.f32 %v423_v22 }
 0x2fa   :  { %v461_v6 = vadd.f32 0.4994258, %v460_v16  ;;  %v497_v37 = vadd.f32 0.014752088, %v496_v8  ;;  %v450_v58 = vadd.f32 0.18741608, %v449_v43  ;;  %v413_v62 = vmul.f32 %v412_v47, %v974_v15 }
 0x2fb   :  { %v523_v38 = vmul.f32 2.1237322e-06, %v1014_v9  ;;  %v534_v39 = vmul.f32 3.8918573e-05, %v1014_v9  ;;  %v487_v52 = vmul.f32 %v486_v32, %v998_v3  ;;  %v436_v36 = vor.u32 1.1754944e-38, %v435_v50 }
 0x2fc   :  { %v462_v12 = vmul.f32 %v461_v6, %v985_v48  ;;  %v498_v44 = vmul.f32 %v497_v37, %v998_v3  ;;  %vm434_vm2 = vcmp.eq.f32.partialorder %v433_v34, 8.507059e+37  ;;  %v451_v20 = vmul.f32 %v450_v58, %v985_v48 }
 0x2fd   :  { %v641_v18 = vpop.eup %640  ;;  %v524_v45 = vadd.f32 0.00028619796, %v523_v38  ;;  %v535_v46 = vadd.f32 0.001143296, %v534_v39  ;;  %v488_v61 = vadd.f32 0.05243302, %v487_v52 }
 0x2fe   :  { %v425_v40 = vmul.f32 %v641_v18, %v423_v22  ;;  %v463_v41 = vadd.f32 1.0, %v462_v12  ;;  %v499_v54 = vadd.f32 0.112945676, %v498_v44  ;;  %vm430_vm14 = vweird.f32 %v641_v18 }
 0x2ff   :  { %v525_v56 = vmul.f32 %v524_v45, %v1014_v9  ;;  %v536_v57 = vmul.f32 %v535_v46, %v1014_v9  ;;  %vm431_vm1 = vmor %vm429_vm15, %vm430_vm14  ;;  %v489_v35 = vmul.f32 %v488_v61, %v998_v3  ;;  %v452_v6 = vadd.f32 1.1283791, %v451_v20 }
 0x300   :  { %v426_v49 = vsub.f32 1.0, %v425_v40  ;;  %642 = vrcp.f32 %v463_v41  ;;  %v500_v60 = vmul.f32 %v499_v54, %v998_v3  ;;  %v475_v15 = vand.u32 2147483648, %v463_v41 }
 0x301   :  { %v537_v53 = vadd.f32 0.014752088, %v536_v57  ;;  %v526_v13 = vadd.f32 0.0036580483, %v525_v56  ;;  %v473_v8 = vand.u32 2147483647, %v463_v41  ;;  %vm469_vm4 = vweird.f32 %v463_v41 }
 0x302   :  { %v427_v55 = vmul.f32 %v641_v18, %v426_v49  ;;  %v501_v63 = vadd.f32 0.4994258, %v500_v60  ;;  %v393_v48 = vmul.f32 0.5, %v971_v33  ;;  %v476_v37 = vor.u32 1.1754944e-38, %v475_v15 }
 0x303   :  { %v538_v17 = vmul.f32 %v537_v53, %v1014_v9  ;;  %v527_v28 = vmul.f32 %v526_v13, %v1014_v9  ;;  %v490_v38 = vadd.f32 0.18741608, %v489_v35  ;;  %v453_v40 = vmul.f32 %v452_v6, %v981_v42 }
 0x304   :  { %v428_v30 = vadd.f32 %v641_v18, %v427_v55  ;;  %v502_v22 = vmul.f32 %v501_v63, %v998_v3  ;;  %vm474_vm6 = vcmp.eq.f32.partialorder %v473_v8, 8.507059e+37  ;;  %v394_v42 = vmul.f32 0.5, %v978_v21 }
 0x305   :  { %v539_v10 = vadd.f32 0.112945676, %v538_v17  ;;  %v528_v39 = vadd.f32 0.05243302, %v527_v28  ;;  %v396_v6 = vmul.f32 0.5, %v1000_v14 }
 0x306   :  { %v643_v4 = vpop.eup %642  ;;  %v432_v11 = vsel %vm431_vm1, %v641_v18, %v428_v30  ;;  %v503_v26 = vadd.f32 1.0, %v502_v22  ;;  %v395_v22 = vmul.f32 0.5, %v987_v51 }
 0x307   :  { %v437_v19 = vsel %vm434_vm2, %v436_v36, %v432_v11  ;;  %v465_v23 = vmul.f32 %v643_v4, %v463_v41  ;;  %v540_v29 = vmul.f32 %v539_v10, %v1014_v9  ;;  %vm470_vm3 = vweird.f32 %v643_v4 }
 0x308   :  { %v438_v27 = vmul.f32 %v437_v19, %v413_v62  ;;  %644 = vrcp.f32 %v503_v26  ;;  %vm471_vm5 = vmor %vm469_vm4, %vm470_vm3  ;;  %v491_v41 = vmul.f32 %v490_v38, %v998_v3  ;;  %v529_v34 = vmul.f32 %v528_v39, %v1014_v9 }
 0x309   :  { %v466_v25 = vsub.f32 1.0, %v465_v23  ;;  %v541_v32 = vadd.f32 0.4994258, %v540_v29  ;;  %v515_v57 = vand.u32 2147483648, %v503_v26  ;;  %v513_v30 = vand.u32 2147483647, %v503_v26 }
 0x30a   :  { %v614_v16 = vclamps-f32 %v438_v27, 1.0  ;;  %v492_v56 = vadd.f32 1.1283791, %v491_v41  ;;  %vm509_vm8 = vweird.f32 %v503_v26 }
 0x30b   :  { %v467_v7 = vmul.f32 %v643_v4, %v466_v25  ;;  %v542_v44 = vmul.f32 %v541_v32, %v1014_v9  ;;  %v516_v36 = vor.u32 1.1754944e-38, %v515_v57  ;;  %vm514_vm10 = vcmp.eq.f32.partialorder %v513_v30, 8.507059e+37 }
 0x30c   :  { %v561_v31 = vadd.f32 1.0, %v614_v16  ;;  %v493_v21 = vmul.f32 %v492_v56, %v992_v59 }
 0x30d   :  { %v468_v12 = vadd.f32 %v643_v4, %v467_v7  ;;  %v543_v47 = vadd.f32 1.0, %v542_v44 }
 0x30e   :  { %v565_v18 = vmul.f32 %v561_v31, %v393_v48  ;;  %v645_v49 = vpop.eup %644 }
 0x30f   :  { %v472_v43 = vsel %vm471_vm5, %v643_v4, %v468_v12  ;;  %v505_v52 = vmul.f32 %v645_v49, %v503_v26  ;;  %646 = vrcp.f32 %v543_v47  ;;  %vm510_vm7 = vweird.f32 %v645_v49 }
 0x310   :  { %v569_v45 = vadd.f32 %v565_v18, %v861_v5  ;;  %v477_v46 = vsel %vm474_vm6, %v476_v37, %v472_v43  ;;  %v530_v5 = vadd.f32 0.18741608, %v529_v34  ;;  %vm511_vm9 = vmor %vm509_vm8, %vm510_vm7  ;;  %v555_v20 = vand.u32 2147483648, %v543_v47 }
 0x311   :  { %v478_v33 = vmul.f32 %v477_v46, %v453_v40  ;;  %v506_v55 = vsub.f32 1.0, %v505_v52  ;;  %v553_v27 = vand.u32 2147483647, %v543_v47  ;;  %vm549_vm12 = vweird.f32 %v543_v47 }
 0x312   :  { %573 = vst.msk [vmem:[#allocation10] sm:$0xff] %vm105_vm0, %v569_v45  ;;  %v531_v61 = vmul.f32 %v530_v5, %v1014_v9  ;;  %v556_v25 = vor.u32 1.1754944e-38, %v555_v20 }
 0x313   :  { %v615_v50 = vclamps-f32 %v478_v33, 1.0  ;;  %v507_v60 = vmul.f32 %v645_v49, %v506_v55  ;;  %vm554_vm14 = vcmp.eq.f32.partialorder %v553_v27, 8.507059e+37 }
 0x314   :  { %v532_v19 = vadd.f32 1.1283791, %v531_v61 }
 0x315   :  { %v562_v54 = vadd.f32 1.0, %v615_v50  ;;  %v508_v62 = vadd.f32 %v645_v49, %v507_v60  ;;  %v647_v3 = vpop.eup %646 }
 0x316   :  { %v545_v4 = vmul.f32 %v647_v3, %v543_v47  ;;  %vm550_vm11 = vweird.f32 %v647_v3  ;;  %v533_v15 = vmul.f32 %v532_v19, %v1006_v24 }
 0x317   :  { %v566_v58 = vmul.f32 %v562_v54, %v394_v42  ;;  %v512_v63 = vsel %vm511_vm9, %v645_v49, %v508_v62  ;;  %vm551_vm13 = vmor %vm549_vm12, %vm550_vm11 }
 0x318   :  { %v517_v11 = vsel %vm514_vm10, %v516_v36, %v512_v63  ;;  %v546_v17 = vsub.f32 1.0, %v545_v4 }
 0x319   :  { %v570_v53 = vadd.f32 %v566_v58, %v858_v2  ;;  %v518_v13 = vmul.f32 %v517_v11, %v493_v21 }
 0x31a   :  { %v547_v23 = vmul.f32 %v647_v3, %v546_v17 }
 0x31b   :  { %574 = vst.msk [vmem:[#allocation10 + $0x8] sm:$0xff] %vm105_vm0, %v570_v53  ;;  %v616_v2 = vclamps-f32 %v518_v13, 1.0 }
 0x31c   :  { %v548_v9 = vadd.f32 %v647_v3, %v547_v23 }
 0x31d   :  { %v563_v10 = vadd.f32 1.0, %v616_v2 }
 0x31e   :  { %v552_v35 = vsel %vm551_vm13, %v647_v3, %v548_v9 }
 0x31f   :  { %v567_v59 = vmul.f32 %v563_v10, %v395_v22  ;;  %v557_v16 = vsel %vm554_vm14, %v556_v25, %v552_v35 }
 0x320   :  { %v558_v28 = vmul.f32 %v557_v16, %v533_v15 }
 0x321   :  { %v571_v26 = vadd.f32 %v567_v59, %v855_v1 }
 0x322   :  { %v617_v29 = vclamps-f32 %v558_v28, 1.0 }
 0x323   :  { %575 = vst.msk [vmem:[#allocation10 + $0x10] sm:$0xff] %vm105_vm0, %v571_v26 }
 0x324   :  { %v564_v51 = vadd.f32 1.0, %v617_v29 }
 0x326   :  { %v568_v7 = vmul.f32 %v564_v51, %v396_v6 }
 0x328   :  { %v572_v24 = vadd.f32 %v568_v7, %v853_v0 }
 0x32a   :  { %576 = vst.msk [vmem:[#allocation10 + $0x18] sm:$0xff] %vm105_vm0, %v572_v24 }
 0x32b   :  { %589 = dma.vmem_to_hbm [thread:$0]  %s582_s28, 512, %s584_s9, [#allocation4], %s777_s13, %s777_s13, %s778_s14  }
 0x32c   :  { %774 = dma.done.wait [#allocation4], 512  }
 0x32d   :  { %775 = vsyncadd [#allocation4], 4294966784 }
 0x32e   :  { %594 = vsyncpa [#allocation3], 1 }
 0x32f   :  { %595 = vsyncpa [#allocation6], 1 }
 0x330   :  { %596 = vsyncpa [#allocation9], 1 }
 0x331   :  { %597 = vsyncpa [#allocation4], 1 }

</bundles_post_ra>
